<compile_context>
chip_gen: v7x
topology: tpu7x:2x2x1
jax: 0.10.0
libtpu: 0.0.40
codegen_flags: <defaults>
</compile_context>

<pallas_src>
import functools

import jax
import jax.numpy as jnp
import numpy as np
from jax.experimental import pallas as pl
from jax.experimental.pallas import tpu as pltpu


# ----------------------------------------------------------------------------
# Generation-aware budgets & small helpers
# ----------------------------------------------------------------------------
def _round_up(x, m):
    return ((x + m - 1) // m) * m


def _tpu_budget():
    """(vmem_limit_bytes, gemm_row_tile_cap, q_tile_cap), generation aware.

    v5e/v6e have 128 MiB physical VMEM -> large scoped limit and tiles;
    v7x only has 64 MiB -> conservative limit and smaller caps.  Falls back
    to the conservative numbers if the query is unavailable.
    """
    cap = None
    try:
        cap = getattr(pltpu.get_tpu_info(), "vmem_capacity_bytes", None)
    except Exception:
        cap = None
    if cap is None:
        cap = 64 * 2 ** 20
    if cap >= 100 * 2 ** 20:            # v5e / v6e (128 MiB physical)
        return 96 * 2 ** 20, 1024, 512
    return 40 * 2 ** 20, 512, 256       # v7x (64 MiB physical): keep headroom


def _const_spec(shape, index_map):
    """BlockSpec for a grid-invariant operand (constant index_map).

    Single-buffered: double-buffering an operand whose block never changes
    just holds two identical copies in VMEM (matters for the fused
    (Cin, 2*Cout) KV weight under v7x's 64 MiB budget).
    """
    if hasattr(pl, "Buffered"):
        try:
            return pl.BlockSpec(shape, index_map, pipeline_mode=pl.Buffered(1))
        except TypeError:
            pass
    return pl.BlockSpec(shape, index_map)


def _pick_row_tile(m, cap):
    """Row tile for projection GEMMs: multiple of 8, >= 2 blocks whenever
    possible (two v7x TensorCores), capped so double-buffered blocks stay
    small in VMEM."""
    if m <= 8:
        return m
    return min(cap, _round_up(pl.cdiv(m, 2), 8))


def _pick_q_tile(sq_pad, batch, cap):
    tq = min(cap, sq_pad)
    if batch * pl.cdiv(sq_pad, tq) < 2 and sq_pad >= 16:
        tq = _round_up(pl.cdiv(sq_pad, 2), 8)   # split so both cores get work
    return tq


# ----------------------------------------------------------------------------
# Row-tiled linear:  o = x @ w + b   (used for the fused K|V projection)
# ----------------------------------------------------------------------------
def _linear_kernel(x_ref, w_ref, b_ref, o_ref):
    # Weights are pre-cast in the wrapper (bf16 on the fast path), so the only
    # per-step cast is the activation block, which is read from HBM anyway.
    x = x_ref[...].astype(w_ref.dtype)
    acc = jnp.dot(x, w_ref[...], preferred_element_type=jnp.float32)
    o_ref[...] = (acc + b_ref[...]).astype(o_ref.dtype)


def linear_pallas(x2d, w, b, *, row_tile_cap, vmem_limit, out_dtype=None):
    """x2d: (M, Cin), w: (Cin, Cout), b: (1, Cout) -> (M, Cout).

    NOTE: when M % tm != 0 the last block is partial; Pallas masks the
    out-of-range output rows and the undefined pad rows of the input block
    are only consumed by this row-wise GEMM (never reduced across rows), so
    they cannot leak into valid outputs.
    """
    M, Cin = x2d.shape
    Cout = w.shape[1]
    tm = _pick_row_tile(M, row_tile_cap)
    return pl.pallas_call(
        _linear_kernel,
        out_shape=jax.ShapeDtypeStruct((M, Cout), out_dtype or x2d.dtype),
        grid=(pl.cdiv(M, tm),),
        in_specs=[
            pl.BlockSpec((tm, Cin), lambda i: (i, 0)),
            _const_spec((Cin, Cout), lambda i: (0, 0)),
            _const_spec((1, Cout), lambda i: (0, 0)),
        ],
        out_specs=pl.BlockSpec((tm, Cout), lambda i: (i, 0)),
        compiler_params=pltpu.CompilerParams(
            dimension_semantics=("parallel",),
            vmem_limit_bytes=vmem_limit,
        ),
    )(x2d, w, b)


# ----------------------------------------------------------------------------
# Fused Q-projection + multi-head attention + residual + output projection.
#   x:  (tq, Cin)       query-token block (f32)
#   kv: (Sk_pad, 2C)    [k | v] from the fused KV projection (bf16 on fast)
#   o:  (tq, C)         final projected output, ONE lane-dense store
# ----------------------------------------------------------------------------
def _attn_kernel(x_ref, kv_ref, wq_ref, bq_ref, wp_ref, bp_ref, o_ref, *,
                 num_heads, head_dim, scale, has_cls, fast, sk_valid):
    C = num_heads * head_dim
    mxu_dt = jnp.bfloat16 if fast else jnp.float32
    tq = o_ref.shape[0]
    sk_pad = kv_ref.shape[0]

    # ---- fused Q projection prologue: (tq, Cin) @ (Cin, C), f32 accumulation
    q = jnp.dot(x_ref[...].astype(mxu_dt), wq_ref[...],
                preferred_element_type=jnp.float32) + bq_ref[...]

    # ---- key mask for the lane-padded reference tokens (static check) ----
    if sk_valid < sk_pad:
        kmask = jnp.where(
            jax.lax.broadcasted_iota(jnp.int32, (1, sk_pad), 1) < sk_valid,
            0.0, -1e30).astype(jnp.float32)
    else:
        kmask = None

    # ---- per-head attention: k/v sliced straight from the kv ref so only q
    #      plus one head's tiles are live at a time (no whole-tile dupes) ----
    heads = []
    for h in range(num_heads):
        sl = slice(h * head_dim, (h + 1) * head_dim)
        q_h = q[:, sl]                                         # (tq, hd) f32
        k_h = kv_ref[:, sl].astype(mxu_dt)                     # (Sk, hd)
        v_h = kv_ref[:, C + h * head_dim:C + (h + 1) * head_dim].astype(mxu_dt)

        s = jax.lax.dot_general(                               # (tq, Sk) f32
            (q_h * scale).astype(mxu_dt), k_h,
            (((1,), (1,)), ((), ())),
            preferred_element_type=jnp.float32)
        if kmask is not None:
            s = s + kmask

        m = jnp.max(s, axis=-1, keepdims=True)                 # f32 stats
        p = jnp.exp(s - m)
        denom = jnp.sum(p, axis=-1, keepdims=True)
        pv = jnp.dot(p.astype(mxu_dt), v_h,
                     preferred_element_type=jnp.float32)       # (tq, hd) f32
        heads.append(pv * pl.reciprocal(denom, approx=fast))

    # ---- lane-dense head merge + residual (cls row-0 skip folded in) ----
    attn = jnp.concatenate(heads, axis=-1)                     # (tq, C) f32
    if has_cls:
        # residual skips only the flattened token index 0 (matches the
        # reference `x[:, :, 1:, :] += q[:, :, 1:, :]`)
        row_ids = (jax.lax.broadcasted_iota(jnp.int32, (tq, 1), 0)
                   + pl.program_id(1) * tq)
        attn = attn + q * jnp.where(row_ids == 0, 0.0, 1.0)
    else:
        attn = attn + q

    # ---- fused output projection epilogue + ONE full-width store ----
    out = jnp.dot(attn.astype(mxu_dt), wp_ref[...],
                  preferred_element_type=jnp.float32) + bp_ref[...]
    o_ref[...] = out.astype(o_ref.dtype)


def attention_pallas(x3, kv3, wq, bq, wproj, bproj, *, num_heads, head_dim,
                     scale, has_cls, fast, sk_valid, vmem_limit, q_tile_cap):
    """x3: (B, Sq_pad, Cin); kv3: (B, Sk_pad, 2C) -> (B, Sq_pad, C)."""
    B, sq_pad, cin = x3.shape
    sk_pad = kv3.shape[1]
    C = num_heads * head_dim
    tq = _pick_q_tile(sq_pad, B, q_tile_cap)
    kern = functools.partial(
        _attn_kernel, num_heads=num_heads, head_dim=head_dim, scale=scale,
        has_cls=has_cls, fast=fast, sk_valid=sk_valid)
    return pl.pallas_call(
        kern,
        out_shape=jax.ShapeDtypeStruct((B, sq_pad, C), x3.dtype),
        grid=(B, pl.cdiv(sq_pad, tq)),
        in_specs=[
            pl.BlockSpec((None, tq, cin), lambda b, i: (b, i, 0)),
            pl.BlockSpec((None, sk_pad, 2 * C), lambda b, i: (b, 0, 0)),
            _const_spec((cin, C), lambda b, i: (0, 0)),
            _const_spec((1, C), lambda b, i: (0, 0)),
            _const_spec((C, C), lambda b, i: (0, 0)),
            _const_spec((1, C), lambda b, i: (0, 0)),
        ],
        out_specs=pl.BlockSpec((None, tq, C), lambda b, i: (b, i, 0)),
        compiler_params=pltpu.CompilerParams(
            dimension_semantics=("parallel", "parallel"),
            vmem_limit_bytes=vmem_limit,
        ),
    )(x3, kv3, wq, bq, wproj, bproj)


# ----------------------------------------------------------------------------
# ReferenceAttention forward (glue in plain JAX, hot path in Pallas)
# ----------------------------------------------------------------------------
def reference_attention_forward(params, x, x_ref, hw_shape, *, num_heads,
                                has_cls_embed=True, fast=True):
    B, T1, N, Cin = x.shape
    T2 = x_ref.shape[1]
    dim_out = params["wq"].shape[1]
    hd = dim_out // num_heads
    scale = hd ** (-0.5)

    # pool_q/pool_k/pool_v are None under the default config -> identity.
    q_shape = list(hw_shape)

    sq, sk = T1 * N, T2 * N
    sq_pad = _round_up(sq, 8)        # sublane-aligned query rows
    sk_pad = _round_up(sk, 128)      # lane-aligned keys (masked in-kernel)

    vmem_limit, row_tile_cap, q_tile_cap = _tpu_budget()

    # Weight prep: fuse K|V into one (Cin, 2*dim_out) matrix (x_ref read from
    # HBM once, lane-dense output), and pre-cast weights to bf16 once on the
    # fast path instead of per grid step inside the kernels.  Biases stay f32.
    # NOTE: prefer fast=True on v5e (its MXU is bf16-native; f32 matmul is 3x+
    # slower) — elementwise softmax math is kept f32 everywhere regardless.
    wcast = (lambda w: w.astype(jnp.bfloat16)) if fast else (lambda w: w)
    wq, wproj = wcast(params["wq"]), wcast(params["wproj"])
    wkv = wcast(jnp.concatenate([params["wk"], params["wv"]], axis=1))
    bq, bproj = params["bq"], params["bproj"]
    bkv = jnp.concatenate([params["bk"], params["bv"]], axis=1)

    # The head-split/merge before the Linear layers in the reference code is a
    # channel-order-preserving round trip, so the Linear inputs are just the
    # flattened (t, n) tokens.  Pad to dense (8,128)-friendly shapes.
    x3 = x.reshape(B, sq, Cin)
    xr3 = x_ref.reshape(B, sk, Cin)
    if sq_pad != sq:
        x3 = jnp.pad(x3, ((0, 0), (0, sq_pad - sq), (0, 0)))
    if sk_pad != sk:
        xr3 = jnp.pad(xr3, ((0, 0), (0, sk_pad - sk), (0, 0)))

    # Fused K|V projection; bf16 output on the fast path so the only HBM
    # intermediate between kernels is half-sized.
    kv = linear_pallas(
        xr3.reshape(B * sk_pad, Cin), wkv, bkv,
        row_tile_cap=row_tile_cap, vmem_limit=vmem_limit,
        out_dtype=(jnp.bfloat16 if fast else x.dtype))
    kv3 = kv.reshape(B, sk_pad, 2 * dim_out)

    # Q projection + attention + residual + output projection in one kernel:
    # q and the attention output never touch HBM, heads are split on
    # VMEM-resident tiles only, and the output store is lane-dense.
    out_pad = attention_pallas(
        x3, kv3, wq, bq, wproj, bproj,
        num_heads=num_heads, head_dim=hd, scale=scale, has_cls=has_cls_embed,
        fast=fast, sk_valid=sk, vmem_limit=vmem_limit, q_tile_cap=q_tile_cap)

    out = out_pad[:, :sq, :].reshape(B, T1, N, dim_out)
    return out, q_shape


# ----------------------------------------------------------------------------
# Pure-JAX reference (for a silent correctness check)
# ----------------------------------------------------------------------------
def _ref_forward(params, x, x_ref, *, num_heads, has_cls_embed=True):
    B, T1, N, C = x.shape
    T2 = x_ref.shape[1]
    dim_out = params["wq"].shape[1]
    hd = dim_out // num_heads
    scale = hd ** (-0.5)

    q = x.reshape(B * T1 * N, C) @ params["wq"] + params["bq"]
    k = x_ref.reshape(B * T2 * N, C) @ params["wk"] + params["bk"]
    v = x_ref.reshape(B * T2 * N, C) @ params["wv"] + params["bv"]

    def to_heads(t, T):
        return (
            t.reshape(B, T, N, num_heads, hd)
            .transpose(0, 3, 1, 2, 4)
            .reshape(B, num_heads, T * N, hd)
        )

    qh, kh, vh = to_heads(q, T1), to_heads(k, T2), to_heads(v, T2)
    s = (qh * scale) @ jnp.swapaxes(kh, -1, -2)
    attn = jax.nn.softmax(s, axis=-1)
    o = attn @ vh
    if has_cls_embed:
        o = o.at[:, :, 1:, :].add(qh[:, :, 1:, :])
    else:
        o = o + qh
    o = o.transpose(0, 2, 1, 3).reshape(B * T1 * N, dim_out)
    out = o @ params["wproj"] + params["bproj"]
    return out.reshape(B, T1, N, dim_out)


# ----------------------------------------------------------------------------
# Deterministic parameter init (qkv_bias=False, proj has bias)
# ----------------------------------------------------------------------------
def init_params(key, dim, dim_out, qkv_bias=False):
    kq, kk, kv, kp, kb = jax.random.split(key, 5)

    def w(k):
        return (jax.random.normal(k, (dim, dim_out), jnp.float32)
                / np.sqrt(dim)).astype(jnp.float32)

    zeros_b = jnp.zeros((1, dim_out), jnp.float32)
    return {
        "wq": w(kq),
        "bq": zeros_b if not qkv_bias else 0.01 * jnp.ones((1, dim_out)),
        "wk": w(kk), "bk": zeros_b,
        "wv": w(kv), "bv": zeros_b,
        "wproj": (jax.random.normal(kp, (dim_out, dim_out), jnp.float32)
                  / np.sqrt(dim_out)).astype(jnp.float32),
        "bproj": 0.01 * jax.random.normal(kb, (1, dim_out), jnp.float32),
    }


if __name__ == "__main__":
    key = jax.random.PRNGKey(0)
    k_x, k_ref, k_par = jax.random.split(key, 3)

    B, T1, T2 = 2, 2, 3
    H = W = 4
    N = 1 + H * W          # cls token + 4x4 spatial tokens
    dim = dim_out = 32
    num_heads = 4
    hw_shape = (H, W)

    x = jax.random.normal(k_x, (B, T1, N, dim), jnp.float32)
    x_ref = jax.random.normal(k_ref, (B, T2, N, dim), jnp.float32)
    params = init_params(k_par, dim, dim_out, qkv_bias=False)

    ref = _ref_forward(params, x, x_ref, num_heads=num_heads,
                       has_cls_embed=True)

    # Exact path (f32 MXU operands, exact reciprocal): tight check vs pure JAX.
    out_f32, q_shape = reference_attention_forward(
        params, x, x_ref, hw_shape, num_heads=num_heads, has_cls_embed=True,
        fast=False)
    out_f32 = jax.block_until_ready(out_f32)
    np.testing.assert_allclose(np.asarray(out_f32), np.asarray(ref),
                               rtol=1e-4, atol=1e-4)

    # Fast path (bf16 MXU operands/weights, bf16 KV intermediate, approx
    # reciprocal, f32 softmax stats): dtype-derived tolerance vs the exact
    # Pallas path (tighter than a loose check vs the pure-JAX ref, so
    # head-slicing / indexing bugs would still be caught).
    out_fast, _ = reference_attention_forward(
        params, x, x_ref, hw_shape, num_heads=num_heads, has_cls_embed=True,
        fast=True)
    out_fast = jax.block_until_ready(out_fast)
    np.testing.assert_allclose(np.asarray(out_fast), np.asarray(out_f32),
                               rtol=5e-2, atol=5e-2)

    assert out_f32.shape == (B, T1, N, dim_out)
    assert out_fast.shape == (B, T1, N, dim_out)
    assert list(q_shape) == list(hw_shape)

    print("KERNEL_OK")
</pallas_src>

<mosaic_0001>
module attributes {stable_mosaic.version = 11 : i64} {
  func.func @_linear_kernel(%arg0: i32, %arg1: memref<128x32xf32, #tpu.memory_space<vmem>>, %arg2: memref<32x64xf32, #tpu.memory_space<vmem>>, %arg3: memref<1x64xf32, #tpu.memory_space<vmem>>, %arg4: memref<128x64xf32, #tpu.memory_space<vmem>>) attributes {dimension_semantics = [#tpu.dimension_semantics<parallel>], iteration_bounds = array<i64: 2>, scalar_prefetch = 0 : i64, scratch_operands = 0 : i64, tpu.core_type = #tpu.core_type<tc>, window_params = [{transform_indices = @transform_0, window_bounds = array<i64: 128, 32>}, {pipeline_mode = #tpu.pipeline_mode<synchronous>, transform_indices = @transform_1, window_bounds = array<i64: 32, 64>}, {pipeline_mode = #tpu.pipeline_mode<synchronous>, transform_indices = @transform_2, window_bounds = array<i64: 1, 64>}, {transform_indices = @transform_3, window_bounds = array<i64: 128, 64>}]} {
    %c0 = arith.constant 0 : index
    %c0_0 = arith.constant 0 : index
    %0 = vector.load %arg1[%c0, %c0_0] : memref<128x32xf32, #tpu.memory_space<vmem>>, vector<128x32xf32>
    %c0_1 = arith.constant 0 : index
    %c0_2 = arith.constant 0 : index
    %1 = vector.load %arg2[%c0_1, %c0_2] : memref<32x64xf32, #tpu.memory_space<vmem>>, vector<32x64xf32>
    %cst = arith.constant dense<0.000000e+00> : vector<128x64xf32>
    %2 = tpu.matmul %0, %1, %cst {dimension_numbers = #tpu.dot_dimension_numbers<[1], [0], [0], [1], [0, 0, 1, 1], [], []>} : vector<128x32xf32>, vector<32x64xf32>, vector<128x64xf32> -> vector<128x64xf32>
    %c0_3 = arith.constant 0 : index
    %c0_4 = arith.constant 0 : index
    %3 = vector.load %arg3[%c0_3, %c0_4] : memref<1x64xf32, #tpu.memory_space<vmem>>, vector<1x64xf32>
    %4 = vector.broadcast %3 : vector<1x64xf32> to vector<128x64xf32>
    %5 = arith.addf %2, %4 : vector<128x64xf32>
    %c0_5 = arith.constant 0 : index
    %c0_6 = arith.constant 0 : index
    %6 = vector.load %arg4[%c0_5, %c0_6] : memref<128x64xf32, #tpu.memory_space<vmem>>, vector<128x64xf32>
    tpu.vector_store %arg4[%c0_5, %c0_6], %5 {strides = array<i32>} : memref<128x64xf32, #tpu.memory_space<vmem>>, vector<128x64xf32>,
    return
  }
  func.func @transform_0(%arg0: i32) -> (i32, i32) {
    %c0_i32 = arith.constant 0 : i32
    %c0_i32_0 = arith.constant 0 : i32
    return %arg0, %c0_i32 : i32, i32
  }
  func.func @transform_1(%arg0: i32) -> (i32, i32) {
    %c0_i32 = arith.constant 0 : i32
    %c0_i32_0 = arith.constant 0 : i32
    %c0_i32_1 = arith.constant 0 : i32
    return %c0_i32, %c0_i32_0 : i32, i32
  }
  func.func @transform_2(%arg0: i32) -> (i32, i32) {
    %c0_i32 = arith.constant 0 : i32
    %c0_i32_0 = arith.constant 0 : i32
    %c0_i32_1 = arith.constant 0 : i32
    return %c0_i32, %c0_i32_0 : i32, i32
  }
  func.func @transform_3(%arg0: i32) -> (i32, i32) {
    %c0_i32 = arith.constant 0 : i32
    %c0_i32_0 = arith.constant 0 : i32
    return %arg0, %c0_i32 : i32, i32
  }
}

</mosaic_0001>

<bundles_post_ra>
// kernel: tpu_custom_call.1
= control target key start
LH: loop header
LB: loop body
LE: loop exit
PB: predicated region body
PF: predicated region fallthrough
CT: control target
= control target key end

     0   :  { %s596_s12 = smov 0   ;;  %s703_s0 = inlined_call_operand.vmem [shape: f32[256,32], index: 0, kind: input, shape index: {}]   ;;  %s704_s1 = inlined_call_operand.vmem [shape: f32[32,64], index: 1, kind: input, shape index: {}]   ;;  %s705_s2 = inlined_call_operand.vmem [shape: f32[1,64], index: 2, kind: input, shape index: {}]   ;;  %s706_s3 = inlined_call_operand.vmem [shape: f32[256,64], index: 3, kind: output, shape index: {}]  }
   0x1 LB: > { %s468_s13 = sadd.s32 4294967295, %s574_s12   ;;  %p472_p0 = scmp.ge.s32.totalorder %s574_s12, 1  ;;  %s574_s12 = sphi %s596_s12, %s13_s12  }
   0x2   : > { %p138_p1 = scmp.lt.s32.totalorder %s574_s12, 3 }
   0x4   : > { %p139_p2 = pnand %p472_p0, %p138_p1 }
   0x5   : > { %v190_v0 = vld [vmem:[%s704_s1] sm:$0xff] (!%p139_p2)  ;;  %v191_v1 = vld [vmem:[%s704_s1 + $0x8] sm:$0xff] (!%p139_p2)  ;;  %v192_v2 = vld [vmem:[%s704_s1 + $0x10] sm:$0xff] (!%p139_p2)  ;;  %s473_s20 = sshll.u32 (!%p139_p2), %s468_s13, 4  ;;  %vm201_vm0 = vcmask (!%p139_p2), 261120   ;;  %vm395_vm1 = vcmask (!%p139_p2), 523264  }
   0x6   : > { %142 = sbr.rel (%p139_p2) target bundleno = 247 (0xf7), region = 32  ;;  %v548_v3 = vpack.c.bf16 (!%p139_p2), %v191_v1, %v190_v0  ;;  %v193_v4 = vld [vmem:[%s704_s1 + $0x18] sm:$0xff] (!%p139_p2)  ;;  %p163_p3 = scmp.lt.s32.totalorder (!%p139_p2), %s473_s20, 31  ;;  %v477_v22 = vld [vmem:[%s705_s2] ss:$0 sm:$0xff] (!%p139_p2) }
   0x7   : > { %v552_v5 = vpack.c.bf16 (!%p139_p2), %v193_v4, %v192_v2 }
   0x8   : > { %549 = vmatprep.subr.bf16.mxu0 (!%p139_p2), %v548_v3  ;;  %556 = vmatprep.subr.bf16.mxu1 (!%p139_p2), %v548_v3 }
   0x9   : > { %551 = vmatpush3.bf16.msra.mxu0 (!%p139_p2), %v548_v3  ;;  %558 = vmatpush3.bf16.msra.mxu1 (!%p139_p2), %v548_v3 }
   0xa   : > { %553 = vmatprep.subr.bf16.mxu0 (!%p139_p2), %v552_v5  ;;  %557 = vmatprep.subr.bf16.mxu1 (!%p139_p2), %v552_v5 }
   0xd   : > { %s708_s20 = smov (!%p163_p3, %s473_s20), 31  ;;  %555 = vmatpush3.bf16.msra.mxu0 %v552_v5  ;;  %559 = vmatpush3.bf16.msra.mxu1 %v552_v5 }
   0xe   : > { %s474_s23 = sshll.u32 %s708_s20, 3 }
   0xf   : > { %s624_s26 = scalar_lea.vmem %s703_s0, %s474_s23  ;;  %s666_s4 = scalar_lea.vmem %s706_s3, %s474_s23 }
  0x10   : > { %v174_v6 = vld [vmem:[%s624_s26] sm:$0xff]  ;;  %v175_v8 = vld [vmem:[%s624_s26 + $0x8] sm:$0xff]  ;;  %v176_v10 = vld [vmem:[%s624_s26 + $0x10] sm:$0xff] }
  0x11   : > { %v182_v7 = vld [vmem:[%s624_s26 + $0x40] sm:$0xff]  ;;  %v183_v9 = vld [vmem:[%s624_s26 + $0x48] sm:$0xff]  ;;  %524 = vmatprep.mubr.msk.f32.mxu0 %vm201_vm0, %v174_v6  ;;  %v184_v11 = vld [vmem:[%s624_s26 + $0x50] sm:$0xff] }
  0x12   : > { %536 = vmatprep.mubr.msk.f32.mxu1 %vm201_vm0, %v182_v7  ;;  %525 = vmatmul.mubr.msk.f32.vlgmr.msra.gmra.mrb[0].mxu0 %vm201_vm0, %v175_v8  ;;  %v177_v12 = vld [vmem:[%s624_s26 + $0x18] sm:$0xff]  ;;  %v178_v14 = vld [vmem:[%s624_s26 + $0x20] sm:$0xff]  ;;  %v179_v16 = vld [vmem:[%s624_s26 + $0x28] sm:$0xff] }
  0x13   : > { %537 = vmatmul.mubr.msk.f32.vlgmr.msra.gmra.mrb[0].mxu1 %vm201_vm0, %v183_v9  ;;  %527 = vmatprep.mubr.msk.f32.mxu0 %vm201_vm0, %v176_v10  ;;  %v185_v13 = vld [vmem:[%s624_s26 + $0x58] sm:$0xff]  ;;  %v186_v15 = vld [vmem:[%s624_s26 + $0x60] sm:$0xff]  ;;  %v187_v17 = vld [vmem:[%s624_s26 + $0x68] sm:$0xff] }
  0x14   : > { %539 = vmatprep.mubr.msk.f32.mxu1 %vm201_vm0, %v184_v11  ;;  %v180_v18 = vld [vmem:[%s624_s26 + $0x30] sm:$0xff]  ;;  %v181_v20 = vld [vmem:[%s624_s26 + $0x38] sm:$0xff] }
  0x15   : > { %v188_v19 = vld [vmem:[%s624_s26 + $0x70] sm:$0xff]  ;;  %v189_v21 = vld [vmem:[%s624_s26 + $0x78] sm:$0xff] }
  0x16   : > { %528 = vmatmul.mubr.msk.f32.gmra.mrb[2].mxu0 %vm201_vm0, %v177_v12 }
  0x17   : > { %540 = vmatmul.mubr.msk.f32.gmra.mrb[2].mxu1 %vm201_vm0, %v185_v13  ;;  %530 = vmatprep.mubr.msk.f32.mxu0 %vm201_vm0, %v178_v14 }
  0x18   : > { %542 = vmatprep.mubr.msk.f32.mxu1 %vm201_vm0, %v186_v15 }
  0x1a   : > { %531 = vmatmul.mubr.msk.f32.gmra.mrb[4].mxu0 %vm201_vm0, %v179_v16 }
  0x1b   : > { %543 = vmatmul.mubr.msk.f32.gmra.mrb[4].mxu1 %vm201_vm0, %v187_v17  ;;  %533 = vmatprep.mubr.msk.f32.mxu0 %vm201_vm0, %v180_v18 }
  0x1c   : > { %545 = vmatprep.mubr.msk.f32.mxu1 %vm201_vm0, %v188_v19 }
  0x1e   : > { %534 = vmatmul.mubr.msk.f32.gmra.mrb[6].mxu0 %vm201_vm0, %v181_v20 }
  0x1f   : > { %546 = vmatmul.mubr.msk.f32.gmra.mrb[6].mxu1 %vm201_vm0, %v189_v21 }
  0xe5   : > { %v526_v23 = vpop.f32.mrb[0].mxu0 }
  0xe6   : > { %v538_v24 = vpop.f32.mrb[0].mxu1  ;;  %v322_v25 = vadd.f32 %v526_v23, %v477_v22  ;;  %v316_v27 = vpop.f32.mrb[1].mxu0 }
  0xe7   : > { %v362_v26 = vadd.f32 %v538_v24, %v477_v22  ;;  %v356_v28 = vpop.f32.mrb[1].mxu1  ;;  %v317_v29 = vadd.f32 %v477_v22, %v316_v27 }
  0xe8   : > { %v357_v30 = vadd.f32 %v477_v22, %v356_v28  ;;  %397 = vst.msk [vmem:[%s666_s4 + $0x8] sm:$0xff] %vm395_vm1, %v322_v25 }
  0xe9   : > { %405 = vst.msk [vmem:[%s666_s4 + $0x48] sm:$0xff] %vm395_vm1, %v362_v26  ;;  %396 = vst.msk [vmem:[%s666_s4] sm:$0xff] %vm395_vm1, %v317_v29  ;;  %v529_v31 = vpop.f32.mrb[2].mxu0 }
  0xea   : > { %404 = vst.msk [vmem:[%s666_s4 + $0x40] sm:$0xff] %vm395_vm1, %v357_v30  ;;  %v541_v32 = vpop.f32.mrb[2].mxu1  ;;  %v332_v33 = vadd.f32 %v529_v31, %v477_v22  ;;  %v326_v35 = vpop.f32.mrb[3].mxu0 }
  0xeb   : > { %v372_v34 = vadd.f32 %v541_v32, %v477_v22  ;;  %v366_v36 = vpop.f32.mrb[3].mxu1  ;;  %v327_v37 = vadd.f32 %v477_v22, %v326_v35 }
  0xec   : > { %v367_v38 = vadd.f32 %v477_v22, %v366_v36  ;;  %399 = vst.msk [vmem:[%s666_s4 + $0x18] sm:$0xff] %vm395_vm1, %v332_v33 }
  0xed   : > { %407 = vst.msk [vmem:[%s666_s4 + $0x58] sm:$0xff] %vm395_vm1, %v372_v34  ;;  %398 = vst.msk [vmem:[%s666_s4 + $0x10] sm:$0xff] %vm395_vm1, %v327_v37  ;;  %v532_v39 = vpop.f32.mrb[4].mxu0 }
  0xee   : > { %406 = vst.msk [vmem:[%s666_s4 + $0x50] sm:$0xff] %vm395_vm1, %v367_v38  ;;  %v544_v40 = vpop.f32.mrb[4].mxu1  ;;  %v342_v41 = vadd.f32 %v532_v39, %v477_v22  ;;  %v336_v43 = vpop.f32.mrb[5].mxu0 }
  0xef   : > { %v382_v42 = vadd.f32 %v544_v40, %v477_v22  ;;  %v376_v44 = vpop.f32.mrb[5].mxu1  ;;  %v337_v45 = vadd.f32 %v477_v22, %v336_v43 }
  0xf0   : > { %v377_v46 = vadd.f32 %v477_v22, %v376_v44  ;;  %401 = vst.msk [vmem:[%s666_s4 + $0x28] sm:$0xff] %vm395_vm1, %v342_v41 }
  0xf1   : > { %409 = vst.msk [vmem:[%s666_s4 + $0x68] sm:$0xff] %vm395_vm1, %v382_v42  ;;  %400 = vst.msk [vmem:[%s666_s4 + $0x20] sm:$0xff] %vm395_vm1, %v337_v45  ;;  %v535_v47 = vpop.f32.mrb[6].mxu0 }
  0xf2   : > { %408 = vst.msk [vmem:[%s666_s4 + $0x60] sm:$0xff] %vm395_vm1, %v377_v46  ;;  %v547_v48 = vpop.f32.mrb[6].mxu1  ;;  %v352_v49 = vadd.f32 %v535_v47, %v477_v22  ;;  %v346_v51 = vpop.f32.mrb[7].mxu0 }
  0xf3   : > { %v392_v50 = vadd.f32 %v547_v48, %v477_v22  ;;  %v386_v52 = vpop.f32.mrb[7].mxu1  ;;  %v347_v53 = vadd.f32 %v477_v22, %v346_v51 }
  0xf4   : > { %v387_v54 = vadd.f32 %v477_v22, %v386_v52  ;;  %403 = vst.msk [vmem:[%s666_s4 + $0x38] sm:$0xff] %vm395_vm1, %v352_v49 }
  0xf5   : > { %411 = vst.msk [vmem:[%s666_s4 + $0x78] sm:$0xff] %vm395_vm1, %v392_v50  ;;  %402 = vst.msk [vmem:[%s666_s4 + $0x30] sm:$0xff] %vm395_vm1, %v347_v53 }
  0xf6   : > { %410 = vst.msk [vmem:[%s666_s4 + $0x70] sm:$0xff] %vm395_vm1, %v387_v54 }
  0xf7 PF: > { %s13_s12 = sadd.s32 1, %s574_s12  }
  0xf8   : > { %p10_p4 = scmp.ge.s32.totalorder %s13_s12, 4  }
  0xfa   :  { %12 = sbr.rel (!%p10_p4) target bundleno = 1 (0x1), region = 62 }

</bundles_post_ra>
